<compile_context>
chip_gen: v6e
topology: v6e:2x2x1
jax: 0.10.0
libtpu: 0.0.40
codegen_flags: <defaults>
</compile_context>

<pallas_src>
import functools

import jax
import jax.numpy as jnp
from jax import lax
from jax.experimental import pallas as pl
from jax.experimental.pallas import tpu as pltpu

EPS = 1e-5  # nn.BatchNorm2d default


# --------------------------- in-kernel helpers ------------------------------
def _row_shift(xd, dy, H):
    """Read row h+dy within each image; zero-fill at top/bottom image edges.

    Uses an XLU sublane roll + one VPU select (no slice/concat VMEM temps).
    """
    if dy == 0:
        return xd
    R, L = xd.shape
    rolled = pltpu.roll(xd, shift=(-dy) % R, axis=0)       # rolled[r] = xd[r+dy]
    rid = lax.broadcasted_iota(jnp.int32, (R, L), 0)
    h = rid % H
    valid = (h != (H - 1)) if dy > 0 else (h != 0)
    return jnp.where(valid, rolled, 0.0)


def _conv3x3_banded(xd, w_ref, H):
    """3x3 'same' conv as ONE MXU matmul on lane-dense activations.

    xd: (N*H, W*C) f32;  w_ref: (3*W*C, W*Cout) block-tridiagonal weights with
    the dx shifts and left/right zero-fill folded in.
    """
    taps = [_row_shift(xd, dy, H) for dy in (-1, 0, 1)]
    pats = jnp.concatenate(taps, axis=1)                    # (N*H, 3*W*C)
    return jnp.dot(pats, w_ref[...], preferred_element_type=jnp.float32)


def _bn_dense(a, g_d, be_d, pool, inv_count):
    """Train-mode BatchNorm, lane-dense; rows reduced first, then one tiny
    (2, L) x (L, L) pool matmul for per-channel broadcast."""
    rowsum = jnp.concatenate(
        [jnp.sum(a, axis=0, keepdims=True),
         jnp.sum(a * a, axis=0, keepdims=True)], axis=0)    # (2, W*Cout)
    pooled = jnp.dot(rowsum, pool, preferred_element_type=jnp.float32)
    mean = pooled[0:1] * inv_count                          # (1, W*Cout)
    ex2 = pooled[1:2] * inv_count
    var = jnp.maximum(ex2 - mean * mean, 0.0)               # guard cancellation
    scale = g_d * lax.rsqrt(var + EPS)
    return (a - mean) * scale + be_d


# ------------------------------- kernel --------------------------------------
def _block_kernel(*refs, N, H, W, Cout, has_proj):
    if has_proj:
        (x_ref, w1_ref, g1_ref, be1_ref,
         w2_ref, g2_ref, be2_ref, pool_ref, ws_ref, bs_ref, o_ref) = refs
    else:
        (x_ref, w1_ref, g1_ref, be1_ref,
         w2_ref, g2_ref, be2_ref, pool_ref, o_ref) = refs

    inv_count = 1.0 / float(N * H * W)
    xd = x_ref[...]                                 # (N*H, W*Cin_p), lane-dense
    pool = pool_ref[...]                            # (W*Cout, W*Cout)

    # conv1 -> bn1 -> relu   (conv bias dropped: cancelled by BN mean subtract)
    a1 = _conv3x3_banded(xd, w1_ref, H)
    h1 = jnp.maximum(_bn_dense(a1, g1_ref[...], be1_ref[...], pool, inv_count), 0.0)

    # conv2 -> bn2
    a2 = _conv3x3_banded(h1, w2_ref, H)
    h2 = _bn_dense(a2, g2_ref[...], be2_ref[...], pool, inv_count)

    # skip path (static branch)
    if has_proj:
        res = jnp.dot(xd, ws_ref[...], preferred_element_type=jnp.float32) + bs_ref[...]
    else:
        res = xd                                    # identity skip (Cin == Cout)

    o_ref[...] = jnp.maximum(h2 + res, 0.0)         # lane-dense (N*H, W*Cout)


# ----------------------- hoisted weight transformation ------------------------
def _banded_conv3x3_weight(w_oihw, width, cin_pad):
    """PyTorch OIHW (Cout, Cin, 3, 3) -> (3*W*Cin_p, W*Cout) banded weights.

    For each dy, the (W*Cin_p, W*Cout) block is tridiagonal over the W pixel
    blocks: block (w'+dx, w') = W[:, :, dy+1, dx+1]^T (dx-shift & edge zero-fill
    folded in).  The three dy blocks are stacked along K.
    """
    cout, cin = w_oihw.shape[0], w_oihw.shape[1]
    cin_p = cin + cin_pad
    blocks = []
    for dy in (-1, 0, 1):
        b = jnp.zeros((width * cin_p, width * cout), jnp.float32)
        for dx in (-1, 0, 1):
            tap = jnp.transpose(w_oihw[:, :, dy + 1, dx + 1], (1, 0)).astype(jnp.float32)
            if cin_pad:
                tap = jnp.pad(tap, ((0, cin_pad), (0, 0)))          # zero rows
            shift_eye = jnp.eye(width, k=-dx, dtype=jnp.float32)    # w_out = w_in - dx
            b = b + jnp.kron(shift_eye, tap)
        blocks.append(b)
    return jnp.concatenate(blocks, axis=0)


def _tile_channels(v, width):
    """(C,) per-channel vector -> (1, W*C) lane-dense row."""
    return jnp.tile(v.astype(jnp.float32), width).reshape(1, -1)


def prepare_params(params, H, W):
    """Once-per-parameter-set transformation (hoisted out of the call path)."""
    Cout, Cin = params["w1"].shape[0], params["w1"].shape[1]
    has_proj = params["ws"] is not None
    if not has_proj:
        assert Cin == Cout, "identity skip requires in_channels == out_channels"

    # Pad input channels so W*Cin is a 128-lane multiple (full vregs, aligned K).
    cin_p = Cin
    if has_proj and (W * Cin) % 128 != 0 and 128 % W == 0:
        step = 128 // W
        cin_p = ((Cin + step - 1) // step) * step
    cin_pad = cin_p - Cin

    dense = {
        "w1": _banded_conv3x3_weight(params["w1"], W, cin_pad),   # (3*W*Cin_p, W*Cout)
        "g1": _tile_channels(params["g1"], W),
        "be1": _tile_channels(params["be1"], W),
        "w2": _banded_conv3x3_weight(params["w2"], W, 0),         # (3*W*Cout, W*Cout)
        "g2": _tile_channels(params["g2"], W),
        "be2": _tile_channels(params["be2"], W),
        # pool[j, j'] = 1 iff j % Cout == j' % Cout (per-channel pool + broadcast).
        "pool": jnp.kron(jnp.ones((W, W), jnp.float32), jnp.eye(Cout, dtype=jnp.float32)),
    }
    if has_proj:
        tap = jnp.transpose(params["ws"][:, :, 0, 0], (1, 0)).astype(jnp.float32)
        if cin_pad:
            tap = jnp.pad(tap, ((0, cin_pad), (0, 0)))
        dense["ws"] = jnp.kron(jnp.eye(W, dtype=jnp.float32), tap)
        dense["bs"] = _tile_channels(params["bs"], W)

    meta = dict(H=H, W=W, Cin=Cin, cin_p=cin_p, Cout=Cout, has_proj=has_proj)
    return dense, meta


# ----------------------------- pallas_call builder ----------------------------
@functools.lru_cache(maxsize=None)
def _build_call(N, H, W, cin_p, Cout, has_proj):
    kernel = functools.partial(_block_kernel, N=N, H=H, W=W, Cout=Cout,
                               has_proj=has_proj)
    n_inputs = 10 if has_proj else 8
    vspec = pl.BlockSpec(memory_space=pltpu.MemorySpace.VMEM)
    M = N * H
    flops = (2 * M * (3 * W * cin_p) * (W * Cout)            # conv1
             + 2 * M * (3 * W * Cout) * (W * Cout)           # conv2
             + (2 * M * (W * cin_p) * (W * Cout) if has_proj else 0)
             + 2 * 2 * 2 * (W * Cout) ** 2)                  # BN pool matmuls
    bytes_accessed = 4 * (M * W * cin_p
                          + 3 * W * cin_p * W * Cout
                          + 3 * W * Cout * W * Cout
                          + (W * Cout) ** 2
                          + (W * cin_p * W * Cout if has_proj else 0)
                          + M * W * Cout)
    return pl.pallas_call(
        kernel,
        out_shape=jax.ShapeDtypeStruct((M, W * Cout), jnp.float32),
        in_specs=[vspec] * n_inputs,
        out_specs=vspec,
        compiler_params=pltpu.CompilerParams(vmem_limit_bytes=32 * 1024 * 1024),
        cost_estimate=pl.CostEstimate(flops=int(flops),
                                      transcendentals=int(2 * W * Cout),
                                      bytes_accessed=int(bytes_accessed)),
    )


def adaptive_residual_block_dense(x_d, dense, meta, N):
    """Lane-dense entry/exit: x_d is (N*H, W*Cin_p), returns (N*H, W*Cout)."""
    call = _build_call(N, meta["H"], meta["W"], meta["cin_p"], meta["Cout"],
                       meta["has_proj"])
    inputs = [x_d, dense["w1"], dense["g1"], dense["be1"],
              dense["w2"], dense["g2"], dense["be2"], dense["pool"]]
    if meta["has_proj"]:
        inputs += [dense["ws"], dense["bs"]]
    return call(*inputs)


def adaptive_residual_block(x_nchw, dense, meta):
    """NCHW in / NCHW out, matching the PyTorch module interface."""
    N, Cin, H, W = x_nchw.shape
    assert (Cin, H, W) == (meta["Cin"], meta["H"], meta["W"])
    cin_pad = meta["cin_p"] - Cin
    x_nhwc = jnp.transpose(x_nchw, (0, 2, 3, 1)).astype(jnp.float32)
    if cin_pad:
        x_nhwc = jnp.pad(x_nhwc, ((0, 0), (0, 0), (0, 0), (0, cin_pad)))
    x_d = x_nhwc.reshape(N * H, W * meta["cin_p"])
    out_d = adaptive_residual_block_dense(x_d, dense, meta, N)
    return jnp.transpose(out_d.reshape(N, H, W, meta["Cout"]), (0, 3, 1, 2))


# ---------------- pure-JAX reference (PyTorch semantics, NCHW) ----------------
def reference(x, params):
    def conv(x, w, b, pad):
        y = lax.conv_general_dilated(
            x, w, window_strides=(1, 1), padding=[(pad, pad), (pad, pad)],
            dimension_numbers=("NCHW", "OIHW", "NCHW"))
        return y + b[None, :, None, None]

    def bn(x, g, be):
        m = jnp.mean(x, axis=(0, 2, 3), keepdims=True)
        v = jnp.mean((x - m) ** 2, axis=(0, 2, 3), keepdims=True)
        return ((x - m) * lax.rsqrt(v + EPS) * g[None, :, None, None]
                + be[None, :, None, None])

    residual = (conv(x, params["ws"], params["bs"], 0)
                if params["ws"] is not None else x)
    out = jax.nn.relu(bn(conv(x, params["w1"], params["b1"], 1),
                         params["g1"], params["be1"]))
    out = bn(conv(out, params["w2"], params["b2"], 1),
             params["g2"], params["be2"])
    return jax.nn.relu(out + residual)


def make_params(key, in_channels, out_channels):
    ks = jax.random.split(key, 10)
    p = {
        "w1": 0.1 * jax.random.normal(ks[0], (out_channels, in_channels, 3, 3), jnp.float32),
        "b1": 0.05 * jax.random.normal(ks[1], (out_channels,), jnp.float32),
        "g1": 1.0 + 0.1 * jax.random.normal(ks[2], (out_channels,), jnp.float32),
        "be1": 0.05 * jax.random.normal(ks[3], (out_channels,), jnp.float32),
        "w2": 0.1 * jax.random.normal(ks[4], (out_channels, out_channels, 3, 3), jnp.float32),
        "b2": 0.05 * jax.random.normal(ks[5], (out_channels,), jnp.float32),
        "g2": 1.0 + 0.1 * jax.random.normal(ks[6], (out_channels,), jnp.float32),
        "be2": 0.05 * jax.random.normal(ks[7], (out_channels,), jnp.float32),
    }
    if in_channels != out_channels:
        p["ws"] = 0.1 * jax.random.normal(ks[8], (out_channels, in_channels, 1, 1), jnp.float32)
        p["bs"] = 0.05 * jax.random.normal(ks[9], (out_channels,), jnp.float32)
    else:
        p["ws"] = None
        p["bs"] = None
    return p


if __name__ == "__main__":
    key = jax.random.PRNGKey(0)
    k_x, k_p, k_x2, k_p2 = jax.random.split(key, 4)

    # Projection-skip case (in_channels != out_channels).
    N, Cin, Cout, H, W = 2, 4, 8, 16, 16
    x = jax.random.normal(k_x, (N, Cin, H, W), jnp.float32)
    params = make_params(k_p, Cin, Cout)
    dense, meta = prepare_params(params, H, W)      # hoisted weight prep (once)
    out = jax.block_until_ready(adaptive_residual_block(x, dense, meta))
    ref = jax.block_until_ready(reference(x, params))
    assert out.shape == (N, Cout, H, W)
    err = float(jnp.max(jnp.abs(out - ref)))
    assert err < 1e-3, err

    # Identity-skip case (in_channels == out_channels).
    x2 = jax.random.normal(k_x2, (N, Cout, H, W), jnp.float32)
    params2 = make_params(k_p2, Cout, Cout)
    dense2, meta2 = prepare_params(params2, H, W)
    out2 = jax.block_until_ready(adaptive_residual_block(x2, dense2, meta2))
    ref2 = jax.block_until_ready(reference(x2, params2))
    err2 = float(jnp.max(jnp.abs(out2 - ref2)))
    assert err2 < 1e-3, err2

    print("KERNEL_OK")
</pallas_src>

<mosaic_0001>
module attributes {stable_mosaic.version = 11 : i64} {
  func.func @_block_kernel(%arg0: memref<32x128xf32, #tpu.memory_space<vmem>>, %arg1: memref<384x128xf32, #tpu.memory_space<vmem>>, %arg2: memref<1x128xf32, #tpu.memory_space<vmem>>, %arg3: memref<1x128xf32, #tpu.memory_space<vmem>>, %arg4: memref<384x128xf32, #tpu.memory_space<vmem>>, %arg5: memref<1x128xf32, #tpu.memory_space<vmem>>, %arg6: memref<1x128xf32, #tpu.memory_space<vmem>>, %arg7: memref<128x128xf32, #tpu.memory_space<vmem>>, %arg8: memref<128x128xf32, #tpu.memory_space<vmem>>, %arg9: memref<1x128xf32, #tpu.memory_space<vmem>>, %arg10: memref<32x128xf32, #tpu.memory_space<vmem>>) attributes {dimension_semantics = [], scalar_prefetch = 0 : i64, scratch_operands = 0 : i64, tpu.core_type = #tpu.core_type<tc>} {
    %c0 = arith.constant 0 : index
    %c0_0 = arith.constant 0 : index
    %0 = vector.load %arg0[%c0, %c0_0] : memref<32x128xf32, #tpu.memory_space<vmem>>, vector<32x128xf32>
    %c0_1 = arith.constant 0 : index
    %c0_2 = arith.constant 0 : index
    %1 = vector.load %arg7[%c0_1, %c0_2] : memref<128x128xf32, #tpu.memory_space<vmem>>, vector<128x128xf32>
    %c1_i32 = arith.constant 1 : i32
    %2 = tpu.dynamic_rotate %0 by %c1_i32 dim 0 : vector<32x128xf32>, i32 -> vector<32x128xf32>
    %3 = tpu.iota {dimensions = array<i32: 0>} : vector<32x128xi32>
    %c16_i32 = arith.constant 16 : i32
    %c0_i32 = arith.constant 0 : i32
    %4 = arith.cmpi eq, %c16_i32, %c0_i32 : i32
    %c1_i32_3 = arith.constant 1 : i32
    %5 = arith.select %4, %c1_i32_3, %c16_i32 : i32
    %6 = vector.broadcast %5 : i32 to vector<32x128xi32>
    %7 = arith.remsi %3, %6 : vector<32x128xi32>
    %c0_i32_4 = arith.constant 0 : i32
    %8 = vector.broadcast %c0_i32_4 : i32 to vector<32x128xi32>
    %9 = arith.cmpi ne, %7, %8 : vector<32x128xi32>
    %c0_i32_5 = arith.constant 0 : i32
    %10 = vector.broadcast %c0_i32_5 : i32 to vector<32x128xi32>
    %11 = arith.cmpi slt, %7, %10 : vector<32x128xi32>
    %c0_i32_6 = arith.constant 0 : i32
    %12 = arith.cmpi slt, %5, %c0_i32_6 : i32
    %13 = vector.broadcast %12 : i1 to vector<32x128xi1>
    %14 = vector.broadcast %13 : vector<32x128xi1> to vector<32x128xi1>
    %15 = arith.xori %11, %14 : vector<32x128xi1>
    %16 = arith.andi %15, %9 : vector<32x128xi1>
    %17 = vector.broadcast %5 : i32 to vector<32x128xi32>
    %18 = arith.addi %7, %17 : vector<32x128xi32>
    %19 = arith.select %16, %18, %7 : vector<32x128xi1>, vector<32x128xi32>
    %c0_i32_7 = arith.constant 0 : i32
    %20 = vector.broadcast %c0_i32_7 : i32 to vector<32x128xi32>
    %21 = arith.cmpi ne, %19, %20 : vector<32x128xi32>
    %cst = arith.constant 0.000000e+00 : f32
    %22 = vector.broadcast %cst : f32 to vector<32x128xf32>
    %23 = arith.select %21, %2, %22 : vector<32x128xi1>, vector<32x128xf32>
    %c31_i32 = arith.constant 31 : i32
    %24 = tpu.dynamic_rotate %0 by %c31_i32 dim 0 : vector<32x128xf32>, i32 -> vector<32x128xf32>
    %25 = tpu.iota {dimensions = array<i32: 0>} : vector<32x128xi32>
    %c16_i32_8 = arith.constant 16 : i32
    %c0_i32_9 = arith.constant 0 : i32
    %26 = arith.cmpi eq, %c16_i32_8, %c0_i32_9 : i32
    %c1_i32_10 = arith.constant 1 : i32
    %27 = arith.select %26, %c1_i32_10, %c16_i32_8 : i32
    %28 = vector.broadcast %27 : i32 to vector<32x128xi32>
    %29 = arith.remsi %25, %28 : vector<32x128xi32>
    %c0_i32_11 = arith.constant 0 : i32
    %30 = vector.broadcast %c0_i32_11 : i32 to vector<32x128xi32>
    %31 = arith.cmpi ne, %29, %30 : vector<32x128xi32>
    %c0_i32_12 = arith.constant 0 : i32
    %32 = vector.broadcast %c0_i32_12 : i32 to vector<32x128xi32>
    %33 = arith.cmpi slt, %29, %32 : vector<32x128xi32>
    %c0_i32_13 = arith.constant 0 : i32
    %34 = arith.cmpi slt, %27, %c0_i32_13 : i32
    %35 = vector.broadcast %34 : i1 to vector<32x128xi1>
    %36 = vector.broadcast %35 : vector<32x128xi1> to vector<32x128xi1>
    %37 = arith.xori %33, %36 : vector<32x128xi1>
    %38 = arith.andi %37, %31 : vector<32x128xi1>
    %39 = vector.broadcast %27 : i32 to vector<32x128xi32>
    %40 = arith.addi %29, %39 : vector<32x128xi32>
    %41 = arith.select %38, %40, %29 : vector<32x128xi1>, vector<32x128xi32>
    %c15_i32 = arith.constant 15 : i32
    %42 = vector.broadcast %c15_i32 : i32 to vector<32x128xi32>
    %43 = arith.cmpi ne, %41, %42 : vector<32x128xi32>
    %cst_14 = arith.constant 0.000000e+00 : f32
    %44 = vector.broadcast %cst_14 : f32 to vector<32x128xf32>
    %45 = arith.select %43, %24, %44 : vector<32x128xi1>, vector<32x128xf32>
    %46 = tpu.concatenate %23, %0, %45 in 1 : vector<32x128xf32>, vector<32x128xf32>, vector<32x128xf32> -> vector<32x384xf32>
    %c0_15 = arith.constant 0 : index
    %c0_16 = arith.constant 0 : index
    %47 = vector.load %arg1[%c0_15, %c0_16] : memref<384x128xf32, #tpu.memory_space<vmem>>, vector<384x128xf32>
    %cst_17 = arith.constant dense<0.000000e+00> : vector<32x128xf32>
    %48 = tpu.matmul %46, %47, %cst_17 {dimension_numbers = #tpu.dot_dimension_numbers<[1], [0], [0], [1], [0, 0, 1, 1], [], []>} : vector<32x384xf32>, vector<384x128xf32>, vector<32x128xf32> -> vector<32x128xf32>
    %c0_18 = arith.constant 0 : index
    %c0_19 = arith.constant 0 : index
    %49 = vector.load %arg2[%c0_18, %c0_19] : memref<1x128xf32, #tpu.memory_space<vmem>>, vector<1x128xf32>
    %c0_20 = arith.constant 0 : index
    %c0_21 = arith.constant 0 : index
    %50 = vector.load %arg3[%c0_20, %c0_21] : memref<1x128xf32, #tpu.memory_space<vmem>>, vector<1x128xf32>
    %cst_22 = arith.constant dense<0.000000e+00> : vector<128xf32>
    %51 = vector.multi_reduction <add>, %48, %cst_22 [0] : vector<32x128xf32> to vector<128xf32>
    %52 = vector.shape_cast %51 : vector<128xf32> to vector<1x128xf32>
    %53 = arith.mulf %48, %48 : vector<32x128xf32>
    %cst_23 = arith.constant dense<0.000000e+00> : vector<128xf32>
    %54 = vector.multi_reduction <add>, %53, %cst_23 [0] : vector<32x128xf32> to vector<128xf32>
    %55 = vector.shape_cast %54 : vector<128xf32> to vector<1x128xf32>
    %56 = tpu.concatenate %52, %55 in 0 : vector<1x128xf32>, vector<1x128xf32> -> vector<2x128xf32>
    %cst_24 = arith.constant dense<0.000000e+00> : vector<2x128xf32>
    %57 = tpu.matmul %56, %1, %cst_24 {dimension_numbers = #tpu.dot_dimension_numbers<[1], [0], [0], [1], [0, 0, 1, 1], [], []>} : vector<2x128xf32>, vector<128x128xf32>, vector<2x128xf32> -> vector<2x128xf32>
    %58 = vector.extract_strided_slice %57 {offsets = [0, 0], sizes = [1, 128], strides = [1, 1]} : vector<2x128xf32> to vector<1x128xf32>
    %cst_25 = arith.constant 0.001953125 : f32
    %59 = vector.broadcast %cst_25 : f32 to vector<1x128xf32>
    %60 = arith.mulf %58, %59 : vector<1x128xf32>
    %61 = vector.extract_strided_slice %57 {offsets = [1, 0], sizes = [1, 128], strides = [1, 1]} : vector<2x128xf32> to vector<1x128xf32>
    %cst_26 = arith.constant 0.001953125 : f32
    %62 = vector.broadcast %cst_26 : f32 to vector<1x128xf32>
    %63 = arith.mulf %61, %62 : vector<1x128xf32>
    %64 = arith.mulf %60, %60 : vector<1x128xf32>
    %65 = arith.subf %63, %64 : vector<1x128xf32>
    %cst_27 = arith.constant 0.000000e+00 : f32
    %66 = vector.broadcast %cst_27 : f32 to vector<1x128xf32>
    %67 = arith.maximumf %65, %66 : vector<1x128xf32>
    %cst_28 = arith.constant 9.99999974E-6 : f32
    %68 = vector.broadcast %cst_28 : f32 to vector<1x128xf32>
    %69 = arith.addf %67, %68 : vector<1x128xf32>
    %70 = math.rsqrt %69 : vector<1x128xf32>
    %71 = arith.mulf %49, %70 : vector<1x128xf32>
    %72 = vector.broadcast %60 : vector<1x128xf32> to vector<32x128xf32>
    %73 = arith.subf %48, %72 : vector<32x128xf32>
    %74 = vector.broadcast %71 : vector<1x128xf32> to vector<32x128xf32>
    %75 = arith.mulf %73, %74 : vector<32x128xf32>
    %76 = vector.broadcast %50 : vector<1x128xf32> to vector<32x128xf32>
    %77 = arith.addf %75, %76 : vector<32x128xf32>
    %cst_29 = arith.constant 0.000000e+00 : f32
    %78 = vector.broadcast %cst_29 : f32 to vector<32x128xf32>
    %79 = arith.maximumf %77, %78 : vector<32x128xf32>
    %c1_i32_30 = arith.constant 1 : i32
    %80 = tpu.dynamic_rotate %79 by %c1_i32_30 dim 0 : vector<32x128xf32>, i32 -> vector<32x128xf32>
    %81 = tpu.iota {dimensions = array<i32: 0>} : vector<32x128xi32>
    %c16_i32_31 = arith.constant 16 : i32
    %c0_i32_32 = arith.constant 0 : i32
    %82 = arith.cmpi eq, %c16_i32_31, %c0_i32_32 : i32
    %c1_i32_33 = arith.constant 1 : i32
    %83 = arith.select %82, %c1_i32_33, %c16_i32_31 : i32
    %84 = vector.broadcast %83 : i32 to vector<32x128xi32>
    %85 = arith.remsi %81, %84 : vector<32x128xi32>
    %c0_i32_34 = arith.constant 0 : i32
    %86 = vector.broadcast %c0_i32_34 : i32 to vector<32x128xi32>
    %87 = arith.cmpi ne, %85, %86 : vector<32x128xi32>
    %c0_i32_35 = arith.constant 0 : i32
    %88 = vector.broadcast %c0_i32_35 : i32 to vector<32x128xi32>
    %89 = arith.cmpi slt, %85, %88 : vector<32x128xi32>
    %c0_i32_36 = arith.constant 0 : i32
    %90 = arith.cmpi slt, %83, %c0_i32_36 : i32
    %91 = vector.broadcast %90 : i1 to vector<32x128xi1>
    %92 = vector.broadcast %91 : vector<32x128xi1> to vector<32x128xi1>
    %93 = arith.xori %89, %92 : vector<32x128xi1>
    %94 = arith.andi %93, %87 : vector<32x128xi1>
    %95 = vector.broadcast %83 : i32 to vector<32x128xi32>
    %96 = arith.addi %85, %95 : vector<32x128xi32>
    %97 = arith.select %94, %96, %85 : vector<32x128xi1>, vector<32x128xi32>
    %c0_i32_37 = arith.constant 0 : i32
    %98 = vector.broadcast %c0_i32_37 : i32 to vector<32x128xi32>
    %99 = arith.cmpi ne, %97, %98 : vector<32x128xi32>
    %cst_38 = arith.constant 0.000000e+00 : f32
    %100 = vector.broadcast %cst_38 : f32 to vector<32x128xf32>
    %101 = arith.select %99, %80, %100 : vector<32x128xi1>, vector<32x128xf32>
    %c31_i32_39 = arith.constant 31 : i32
    %102 = tpu.dynamic_rotate %79 by %c31_i32_39 dim 0 : vector<32x128xf32>, i32 -> vector<32x128xf32>
    %103 = tpu.iota {dimensions = array<i32: 0>} : vector<32x128xi32>
    %c16_i32_40 = arith.constant 16 : i32
    %c0_i32_41 = arith.constant 0 : i32
    %104 = arith.cmpi eq, %c16_i32_40, %c0_i32_41 : i32
    %c1_i32_42 = arith.constant 1 : i32
    %105 = arith.select %104, %c1_i32_42, %c16_i32_40 : i32
    %106 = vector.broadcast %105 : i32 to vector<32x128xi32>
    %107 = arith.remsi %103, %106 : vector<32x128xi32>
    %c0_i32_43 = arith.constant 0 : i32
    %108 = vector.broadcast %c0_i32_43 : i32 to vector<32x128xi32>
    %109 = arith.cmpi ne, %107, %108 : vector<32x128xi32>
    %c0_i32_44 = arith.constant 0 : i32
    %110 = vector.broadcast %c0_i32_44 : i32 to vector<32x128xi32>
    %111 = arith.cmpi slt, %107, %110 : vector<32x128xi32>
    %c0_i32_45 = arith.constant 0 : i32
    %112 = arith.cmpi slt, %105, %c0_i32_45 : i32
    %113 = vector.broadcast %112 : i1 to vector<32x128xi1>
    %114 = vector.broadcast %113 : vector<32x128xi1> to vector<32x128xi1>
    %115 = arith.xori %111, %114 : vector<32x128xi1>
    %116 = arith.andi %115, %109 : vector<32x128xi1>
    %117 = vector.broadcast %105 : i32 to vector<32x128xi32>
    %118 = arith.addi %107, %117 : vector<32x128xi32>
    %119 = arith.select %116, %118, %107 : vector<32x128xi1>, vector<32x128xi32>
    %c15_i32_46 = arith.constant 15 : i32
    %120 = vector.broadcast %c15_i32_46 : i32 to vector<32x128xi32>
    %121 = arith.cmpi ne, %119, %120 : vector<32x128xi32>
    %cst_47 = arith.constant 0.000000e+00 : f32
    %122 = vector.broadcast %cst_47 : f32 to vector<32x128xf32>
    %123 = arith.select %121, %102, %122 : vector<32x128xi1>, vector<32x128xf32>
    %124 = tpu.concatenate %101, %79, %123 in 1 : vector<32x128xf32>, vector<32x128xf32>, vector<32x128xf32> -> vector<32x384xf32>
    %c0_48 = arith.constant 0 : index
    %c0_49 = arith.constant 0 : index
    %125 = vector.load %arg4[%c0_48, %c0_49] : memref<384x128xf32, #tpu.memory_space<vmem>>, vector<384x128xf32>
    %cst_50 = arith.constant dense<0.000000e+00> : vector<32x128xf32>
    %126 = tpu.matmul %124, %125, %cst_50 {dimension_numbers = #tpu.dot_dimension_numbers<[1], [0], [0], [1], [0, 0, 1, 1], [], []>} : vector<32x384xf32>, vector<384x128xf32>, vector<32x128xf32> -> vector<32x128xf32>
    %c0_51 = arith.constant 0 : index
    %c0_52 = arith.constant 0 : index
    %127 = vector.load %arg5[%c0_51, %c0_52] : memref<1x128xf32, #tpu.memory_space<vmem>>, vector<1x128xf32>
    %c0_53 = arith.constant 0 : index
    %c0_54 = arith.constant 0 : index
    %128 = vector.load %arg6[%c0_53, %c0_54] : memref<1x128xf32, #tpu.memory_space<vmem>>, vector<1x128xf32>
    %cst_55 = arith.constant dense<0.000000e+00> : vector<128xf32>
    %129 = vector.multi_reduction <add>, %126, %cst_55 [0] : vector<32x128xf32> to vector<128xf32>
    %130 = vector.shape_cast %129 : vector<128xf32> to vector<1x128xf32>
    %131 = arith.mulf %126, %126 : vector<32x128xf32>
    %cst_56 = arith.constant dense<0.000000e+00> : vector<128xf32>
    %132 = vector.multi_reduction <add>, %131, %cst_56 [0] : vector<32x128xf32> to vector<128xf32>
    %133 = vector.shape_cast %132 : vector<128xf32> to vector<1x128xf32>
    %134 = tpu.concatenate %130, %133 in 0 : vector<1x128xf32>, vector<1x128xf32> -> vector<2x128xf32>
    %cst_57 = arith.constant dense<0.000000e+00> : vector<2x128xf32>
    %135 = tpu.matmul %134, %1, %cst_57 {dimension_numbers = #tpu.dot_dimension_numbers<[1], [0], [0], [1], [0, 0, 1, 1], [], []>} : vector<2x128xf32>, vector<128x128xf32>, vector<2x128xf32> -> vector<2x128xf32>
    %136 = vector.extract_strided_slice %135 {offsets = [0, 0], sizes = [1, 128], strides = [1, 1]} : vector<2x128xf32> to vector<1x128xf32>
    %cst_58 = arith.constant 0.001953125 : f32
    %137 = vector.broadcast %cst_58 : f32 to vector<1x128xf32>
    %138 = arith.mulf %136, %137 : vector<1x128xf32>
    %139 = vector.extract_strided_slice %135 {offsets = [1, 0], sizes = [1, 128], strides = [1, 1]} : vector<2x128xf32> to vector<1x128xf32>
    %cst_59 = arith.constant 0.001953125 : f32
    %140 = vector.broadcast %cst_59 : f32 to vector<1x128xf32>
    %141 = arith.mulf %139, %140 : vector<1x128xf32>
    %142 = arith.mulf %138, %138 : vector<1x128xf32>
    %143 = arith.subf %141, %142 : vector<1x128xf32>
    %cst_60 = arith.constant 0.000000e+00 : f32
    %144 = vector.broadcast %cst_60 : f32 to vector<1x128xf32>
    %145 = arith.maximumf %143, %144 : vector<1x128xf32>
    %cst_61 = arith.constant 9.99999974E-6 : f32
    %146 = vector.broadcast %cst_61 : f32 to vector<1x128xf32>
    %147 = arith.addf %145, %146 : vector<1x128xf32>
    %148 = math.rsqrt %147 : vector<1x128xf32>
    %149 = arith.mulf %127, %148 : vector<1x128xf32>
    %150 = vector.broadcast %138 : vector<1x128xf32> to vector<32x128xf32>
    %151 = arith.subf %126, %150 : vector<32x128xf32>
    %152 = vector.broadcast %149 : vector<1x128xf32> to vector<32x128xf32>
    %153 = arith.mulf %151, %152 : vector<32x128xf32>
    %154 = vector.broadcast %128 : vector<1x128xf32> to vector<32x128xf32>
    %155 = arith.addf %153, %154 : vector<32x128xf32>
    %c0_62 = arith.constant 0 : index
    %c0_63 = arith.constant 0 : index
    %156 = vector.load %arg8[%c0_62, %c0_63] : memref<128x128xf32, #tpu.memory_space<vmem>>, vector<128x128xf32>
    %cst_64 = arith.constant dense<0.000000e+00> : vector<32x128xf32>
    %157 = tpu.matmul %0, %156, %cst_64 {dimension_numbers = #tpu.dot_dimension_numbers<[1], [0], [0], [1], [0, 0, 1, 1], [], []>} : vector<32x128xf32>, vector<128x128xf32>, vector<32x128xf32> -> vector<32x128xf32>
    %c0_65 = arith.constant 0 : index
    %c0_66 = arith.constant 0 : index
    %158 = vector.load %arg9[%c0_65, %c0_66] : memref<1x128xf32, #tpu.memory_space<vmem>>, vector<1x128xf32>
    %159 = vector.broadcast %158 : vector<1x128xf32> to vector<32x128xf32>
    %160 = arith.addf %157, %159 : vector<32x128xf32>
    %161 = arith.addf %155, %160 : vector<32x128xf32>
    %cst_67 = arith.constant 0.000000e+00 : f32
    %162 = vector.broadcast %cst_67 : f32 to vector<32x128xf32>
    %163 = arith.maximumf %161, %162 : vector<32x128xf32>
    %c0_68 = arith.constant 0 : index
    %c0_69 = arith.constant 0 : index
    %164 = vector.load %arg10[%c0_68, %c0_69] : memref<32x128xf32, #tpu.memory_space<vmem>>, vector<32x128xf32>
    tpu.vector_store %arg10[%c0_68, %c0_69], %163 {strides = array<i32>} : memref<32x128xf32, #tpu.memory_space<vmem>>, vector<32x128xf32>,
    return
  }
}

</mosaic_0001>

<bundles_post_ra>
// kernel: tpu_custom_call.1
= control target key start
LH: loop header
LB: loop body
LE: loop exit
PB: predicated region body
PF: predicated region fallthrough
CT: control target
= control target key end

     0   :  { %15 = vsyncpa [#allocation3], 0  ;;  %s1988_s0 = inlined_call_operand.hbm [shape: f32[32,128], index: 0, kind: input, shape index: {}]   ;;  %s1989_s1 = inlined_call_operand.hbm [shape: f32[384,128], index: 1, kind: input, shape index: {}]   ;;  %s1990_s2 = inlined_call_operand.vmem [shape: f32[1,128], index: 2, kind: input, shape index: {}]   ;;  %s1991_s3 = inlined_call_operand.vmem [shape: f32[1,128], index: 3, kind: input, shape index: {}]   ;;  %s1992_s4 = inlined_call_operand.hbm [shape: f32[384,128], index: 4, kind: input, shape index: {}]   ;;  %s1993_s5 = inlined_call_operand.vmem [shape: f32[1,128], index: 5, kind: input, shape index: {}]   ;;  %s1994_s6 = inlined_call_operand.vmem [shape: f32[1,128], index: 6, kind: input, shape index: {}]   ;;  %s1995_s7 = inlined_call_operand.hbm [shape: f32[128,128], index: 7, kind: input, shape index: {}]   ;;  %s1996_s8 = inlined_call_operand.hbm [shape: f32[128,128], index: 8, kind: input, shape index: {}]   ;;  %s1997_s9 = inlined_call_operand.vmem [shape: f32[1,128], index: 9, kind: input, shape index: {}]   ;;  %s1998_s10 = inlined_call_operand.hbm [shape: f32[32,128], index: 10, kind: output, shape index: {}]  }
   0x1   :  { %16 = vsyncpa [#allocation6], 0 }
   0x2   :  { %17 = vsyncpa [#allocation9], 0 }
   0x3   :  { %18 = vsyncpa [#allocation4], 0  ;;  %s1635_s13 = smov [#allocation5]   ;;  %s1636_s15 = smov [#allocation8]  }
   0x4   :  { %s36_s14 = sshll.u32 %s1635_s13, 4  ;;  %s68_s16 = sshll.u32 %s1636_s15, 4  ;;  %s37_s14 = int_to_ptr.vmem [resolvable:$true] %s36_s14  ;;  %s69_s16 = int_to_ptr.vmem [resolvable:$true] %s68_s16 }
   0x5   :  { %s1515_s17 = scalar_lea.vmem %s37_s14, 6144  ;;  %p1520_p1 = scmp.lt.s32.totalorder %s37_s14, %s37_s14 }
   0x6   :  { %p1516_p0 = scmp.ne.s32.totalorder %s37_s14, %s1515_s17  ;;  %p1521_p2 = scmp.lt.s32.totalorder %s1515_s17, %s1515_s17 }
   0x8   :  { %p1522_p3 = por %p1521_p2, %p1520_p1 }
   0xa   :  { %p1523_p4 = pnand %p1522_p3, %p1516_p0 }
   0xc   :  { %1526 = shalt.err (!%p1523_p4)
}
   0xd   :  { %s1637_s18 = smov 128   ;;  %s1638_s19 = smov 8  }
   0xe   :  { %42 = dma.hbm_to_vmem [thread:$0]  %s1989_s1, 6144, %s37_s14, [#allocation6], %s1637_s18, %s1637_s18, %s1638_s19  }
   0xf   :  { %s1535_s22 = scalar_lea.vmem %s69_s16, 2048  ;;  %p1540_p6 = scmp.lt.s32.totalorder %s69_s16, %s69_s16 }
  0x10   :  { %p1536_p5 = scmp.ne.s32.totalorder %s69_s16, %s1535_s22  ;;  %p1541_p7 = scmp.lt.s32.totalorder %s1535_s22, %s1535_s22 }
  0x12   :  { %p1542_p8 = por %p1541_p7, %p1540_p6 }
  0x14   :  { %p1543_p9 = pnand %p1542_p8, %p1536_p5 }
  0x16   :  { %1546 = shalt.err (!%p1543_p9)
}
  0x17   :  { %74 = dma.hbm_to_vmem [thread:$0]  %s1995_s7, 2048, %s69_s16, [#allocation9], %s1637_s18, %s1637_s18, %s1638_s19  }
  0x18   :  { %s1639_s25 = smov [#allocation2]   ;;  %s1640_s27 = smov [#allocation7]  }
  0x19   :  { %s24_s26 = sshll.u32 %s1639_s25, 4  ;;  %s52_s28 = sshll.u32 %s1640_s27, 4  ;;  %s25_s26 = int_to_ptr.vmem [resolvable:$true] %s24_s26  ;;  %s53_s28 = int_to_ptr.vmem [resolvable:$true] %s52_s28 }
  0x1a   :  { %s1555_s1 = scalar_lea.vmem %s25_s26, 512  ;;  %p1560_p11 = scmp.lt.s32.totalorder %s25_s26, %s25_s26 }
  0x1b   :  { %p1556_p10 = scmp.ne.s32.totalorder %s25_s26, %s1555_s1  ;;  %p1561_p12 = scmp.lt.s32.totalorder %s1555_s1, %s1555_s1 }
  0x1d   :  { %p1562_p13 = por %p1561_p12, %p1560_p11 }
  0x1f   :  { %p1563_p0 = pnand %p1562_p13, %p1556_p10 }
  0x21   :  { %1566 = shalt.err (!%p1563_p0)
}
  0x22   :  { %30 = dma.hbm_to_vmem [thread:$0]  %s1988_s0, 512, %s25_s26, [#allocation3], %s1637_s18, %s1637_s18, %s1638_s19  }
  0x23   :  { %s1575_s7 = scalar_lea.vmem %s53_s28, 6144  ;;  %p1580_p2 = scmp.lt.s32.totalorder %s53_s28, %s53_s28 }
  0x24   :  { %p1576_p1 = scmp.ne.s32.totalorder %s53_s28, %s1575_s7  ;;  %p1581_p3 = scmp.lt.s32.totalorder %s1575_s7, %s1575_s7 }
  0x26   :  { %p1582_p4 = por %p1581_p3, %p1580_p2 }
  0x28   :  { %p1583_p5 = pnand %p1582_p4, %p1576_p1 }
  0x2a   :  { %1586 = shalt.err (!%p1583_p5)
}
  0x2b   :  { %58 = dma.hbm_to_vmem [thread:$0]  %s1992_s4, 6144, %s53_s28, [#allocation6], %s1637_s18, %s1637_s18, %s1638_s19  }
  0x2c   :  { %s1641_s13 = smov [#allocation10]  }
  0x2d   :  { %s80_s14 = sshll.u32 %s1641_s13, 4  ;;  %s81_s14 = int_to_ptr.vmem [resolvable:$true] %s80_s14 }
  0x2e   :  { %s1595_s15 = scalar_lea.vmem %s81_s14, 2048  ;;  %p1600_p7 = scmp.lt.s32.totalorder %s81_s14, %s81_s14 }
  0x2f   :  { %p1596_p6 = scmp.ne.s32.totalorder %s81_s14, %s1595_s15  ;;  %p1601_p8 = scmp.lt.s32.totalorder %s1595_s15, %s1595_s15 }
  0x31   :  { %p1602_p9 = por %p1601_p8, %p1600_p7 }
  0x33   :  { %p1603_p10 = pnand %p1602_p9, %p1596_p6 }
  0x35   :  { %1606 = shalt.err (!%p1603_p10)
}
  0x36   :  { %86 = dma.hbm_to_vmem [thread:$0]  %s1996_s8, 2048, %s81_s14, [#allocation9], %s1637_s18, %s1637_s18, %s1638_s19  }
  0x37   :  { %1627 = dma.done.wait [#allocation3], 512  }
  0x38   :  { %1628 = vsyncadd [#allocation3], 4294966784 }
  0x39   :  { %1629 = dma.done.wait [#allocation6], 12288  }
  0x3a   :  { %1630 = vsyncadd [#allocation6], 4294955008 }
  0x3b   :  { %1631 = dma.done.wait [#allocation9], 4096  }
  0x3c   :  { %1632 = vsyncadd [#allocation9], 4294963200  ;;  %v242_v0 = vld [vmem:[#allocation5 + $0xf8] sm:$0xff]  ;;  %v241_v2 = vld [vmem:[#allocation5 + $0xf0] sm:$0xff]  ;;  %v128_v22 = vlaneseq  ;;  %vm1643_vm6 = vmmov 0   ;;  %vm453_vm7 = vcmask 1040384  }
  0x3d   :  { %v226_v1 = vld [vmem:[#allocation5 + $0x78] sm:$0xff]  ;;  %1126 = vmatprep.subr.mxu1 %v242_v0  ;;  %v225_v3 = vld [vmem:[#allocation5 + $0x70] sm:$0xff]  ;;  %v240_v4 = vld [vmem:[#allocation5 + $0xe8] sm:$0xff] }
  0x3e   :  { %1127 = vmatpush3.msra.mxu1 %v226_v1  ;;  %v224_v5 = vld [vmem:[#allocation5 + $0x68] sm:$0xff]  ;;  %v239_v6 = vld [vmem:[#allocation5 + $0xe0] sm:$0xff]  ;;  %v238_v8 = vld [vmem:[#allocation5 + $0xd8] sm:$0xff]  ;;  %v1734_v27 = vshrl.u32 %v128_v22, 7 }
  0x3f   :  { %1128 = vmatprep.subr.mxu1 %v241_v2  ;;  %v223_v7 = vld [vmem:[#allocation5 + $0x60] sm:$0xff]  ;;  %v222_v9 = vld [vmem:[#allocation5 + $0x58] sm:$0xff]  ;;  %v237_v10 = vld [vmem:[#allocation5 + $0xd0] sm:$0xff] }
  0x40   :  { %1129 = vmatpush3.msra.mxu1 %v225_v3  ;;  %v221_v11 = vld [vmem:[#allocation5 + $0x50] sm:$0xff]  ;;  %v236_v12 = vld [vmem:[#allocation5 + $0xc8] sm:$0xff]  ;;  %v1731_v13 = vld [vmem:[#allocation2] sm:$0xff]  ;;  %v142_v35 = vand.u32 15, %v1734_v27  ;;  %vm130_vm0 = vcmp.lt.s32.totalorder %v1734_v27, 1  ;;  %v136_v44 = vadd.s32 16, %v1734_v27 }
  0x41   :  { %1130 = vmatprep.subr.mxu1 %v240_v4  ;;  %v220_v14 = vld [vmem:[#allocation5 + $0x48] sm:$0xff]  ;;  %323 = vmatprep.mubr.f32.mxu1 %v1731_v13  ;;  %v235_v15 = vld [vmem:[#allocation5 + $0xc0] sm:$0xff]  ;;  %v234_v17 = vld [vmem:[#allocation5 + $0xb8] sm:$0xff]  ;;  %v124_v33 = vrot.slane %v1731_v13, 7  ;;  %v194_v55 = vrot.slane %v1731_v13, 1  ;;  %vm198_vm3 = vcmp.lt.s32.totalorder %v1734_v27, 7 }
  0x42   :  { %1131 = vmatpush3.msra.mxu1 %v224_v5  ;;  %v219_v16 = vld [vmem:[#allocation5 + $0x40] sm:$0xff]  ;;  %v218_v18 = vld [vmem:[#allocation5 + $0x38] sm:$0xff]  ;;  %v233_v19 = vld [vmem:[#allocation5 + $0xb0] sm:$0xff]  ;;  %vm1746_vm1 = vcmp.ne.s32.totalorder %v142_v35, 0  ;;  %v156_v50 = vand.u32 15, %v136_v44  ;;  %v135_v3 = vadd.s32 8, %v1734_v27 }
  0x43   :  { %1132 = vmatprep.subr.mxu1 %v239_v6  ;;  %v217_v20 = vld [vmem:[#allocation5 + $0x30] sm:$0xff]  ;;  %v232_v21 = vld [vmem:[#allocation5 + $0xa8] sm:$0xff]  ;;  %v231_v24 = vld [vmem:[#allocation5 + $0xa0] sm:$0xff] }
  0x44   :  { %1133 = vmatpush3.msra.mxu1 %v223_v7  ;;  %v216_v23 = vld [vmem:[#allocation5 + $0x28] sm:$0xff]  ;;  %v215_v25 = vld [vmem:[#allocation5 + $0x20] sm:$0xff]  ;;  %v230_v26 = vld [vmem:[#allocation5 + $0x98] sm:$0xff]  ;;  %vm1763_vm2 = vcmp.ne.s32.totalorder %v156_v50, 0  ;;  %v149_v7 = vand.u32 15, %v135_v3 }
  0x45   :  { %1134 = vmatprep.subr.mxu1 %v238_v8  ;;  %v214_v28 = vld [vmem:[#allocation5 + $0x18] sm:$0xff]  ;;  %v229_v30 = vld [vmem:[#allocation5 + $0x90] sm:$0xff]  ;;  %v228_v32 = vld [vmem:[#allocation5 + $0x88] sm:$0xff]  ;;  %v137_v8 = vadd.s32 24, %v1734_v27 }
  0x46   :  { %1135 = vmatpush3.msra.mxu1 %v222_v9  ;;  %v1736_v29 = vld [vmem:[#allocation2 + $0x18] sm:$0xff]  ;;  %v213_v31 = vld [vmem:[#allocation5 + $0x10] sm:$0xff]  ;;  %v212_v36 = vld [vmem:[#allocation5 + $0x8] sm:$0xff]  ;;  %vm1783_vm4 = vcmp.ne.s32.totalorder %v149_v7, 15 }
  0x47   :  { %1136 = vmatprep.subr.mxu1 %v237_v10  ;;  %v127_v34 = vrot.slane %v1736_v29, 7  ;;  %v1742_v37 = vld [vmem:[#allocation2 + $0x8] sm:$0xff]  ;;  %v227_v38 = vld [vmem:[#allocation5 + $0x80] sm:$0xff]  ;;  %v258_v42 = vld [vmem:[#allocation5 + $0x178] sm:$0xff]  ;;  %v197_v9 = vrot.slane %v1736_v29, 1 }
  0x48   :  { %1137 = vmatpush3.msra.mxu1 %v221_v11  ;;  %v211_v39 = vld [vmem:[#allocation5] sm:$0xff]  ;;  %v125_v43 = vrot.slane %v1742_v37, 7  ;;  %v1752_v45 = vld [vmem:[#allocation2 + $0x10] sm:$0xff]  ;;  %v256_v47 = vld [vmem:[#allocation5 + $0x168] sm:$0xff]  ;;  %v195_v56 = vrot.slane %v1742_v37, 1 }
  0x49   :  { %1138 = vmatprep.subr.mxu1 %v236_v12  ;;  %v134_v40 = vsel %vm130_vm0, %v127_v34, %v124_v33  ;;  %v257_v46 = vld [vmem:[#allocation5 + $0x170] sm:$0xff]  ;;  %v126_v49 = vrot.slane %v1752_v45, 7  ;;  %v255_v51 = vld [vmem:[#allocation5 + $0x160] sm:$0xff]  ;;  %v254_v52 = vld [vmem:[#allocation5 + $0x158] sm:$0xff]  ;;  %v196_v5 = vrot.slane %v1752_v45, 1 }
  0x4a   :  { %1139 = vmatpush3.msra.mxu1 %v220_v14  ;;  %v133_v48 = vsel %vm130_vm0, %v124_v33, %v125_v43  ;;  %v253_v57 = vld [vmem:[#allocation5 + $0x150] sm:$0xff]  ;;  %v252_v58 = vld [vmem:[#allocation5 + $0x148] sm:$0xff]  ;;  %v201_v60 = vsel %vm198_vm3, %v194_v55, %v195_v56  ;;  %v251_v61 = vld [vmem:[#allocation5 + $0x140] sm:$0xff]  ;;  %v163_v14 = vand.u32 15, %v137_v8 }
  0x4b   :  { %1140 = vmatprep.subr.mxu1 %v235_v15  ;;  %v132_v53 = vsel %vm130_vm0, %v125_v43, %v126_v49  ;;  %v131_v59 = vsel %vm130_vm0, %v126_v49, %v127_v34  ;;  %v250_v62 = vld [vmem:[#allocation5 + $0x138] sm:$0xff]  ;;  %v249_v63 = vld [vmem:[#allocation5 + $0x130] sm:$0xff]  ;;  %v248_v0 = vld [vmem:[#allocation5 + $0x128] sm:$0xff]  ;;  %v200_v11 = vsel %vm198_vm3, %v195_v56, %v196_v5  ;;  %v199_v15 = vsel %vm198_vm3, %v196_v5, %v197_v9 }
  0x4c   :  { %1141 = vmatpush3.msra.mxu1 %v219_v16  ;;  %v247_v1 = vld [vmem:[#allocation5 + $0x120] sm:$0xff]  ;;  %v246_v2 = vld [vmem:[#allocation5 + $0x118] sm:$0xff]  ;;  %v245_v4 = vld [vmem:[#allocation5 + $0x110] sm:$0xff]  ;;  %v202_v16 = vsel %vm198_vm3, %v197_v9, %v194_v55  ;;  %vm1793_vm5 = vcmp.ne.s32.totalorder %v163_v14, 15 }
  0x4d   :  { %1142 = vmatprep.subr.mxu1 %v234_v17  ;;  %v244_v6 = vld [vmem:[#allocation5 + $0x108] sm:$0xff]  ;;  %v243_v10 = vld [vmem:[#allocation5 + $0x100] sm:$0xff]  ;;  %v1848_v33 = vld [vmem:[#allocation8 + $0x18] sm:$0xff] }
  0x4e   :  { %1143 = vmatpush3.msra.mxu1 %v218_v18  ;;  %v1799_v18 = vld [vmem:[#allocation8 + $0x78] sm:$0xff]  ;;  %v1812_v22 = vld [vmem:[#allocation8 + $0x60] sm:$0xff]  ;;  %v1852_v34 = vld [vmem:[#allocation8 + $0x10] sm:$0xff] }
  0x4f   :  { %1144 = vmatprep.subr.mxu1 %v233_v19  ;;  %v1642_v19 = vmov 0.0   ;;  %v1856_v35 = vld [vmem:[#allocation8 + $0x8] sm:$0xff] }
  0x50   :  { %1145 = vmatpush3.msra.mxu1 %v217_v20  ;;  %1346 = vmatprep.subr.mxu0 %v1642_v19  ;;  %v1802_v20 = vld [vmem:[#allocation8 + $0x70] sm:$0xff]  ;;  %v989_v54 = vld [vmem:[#allocation10 + $0x68] sm:$0xff] }
  0x51   :  { %1146 = vmatprep.subr.mxu1 %v232_v21  ;;  %1347 = vmatpush3.msra.mxu0 %v1799_v18  ;;  %v1808_v21 = vld [vmem:[#allocation8 + $0x68] sm:$0xff] }
  0x52   :  { %1147 = vmatpush3.msra.mxu1 %v216_v23  ;;  %1348 = vmatprep.subr.mxu0 %v1642_v19  ;;  %v1816_v23 = vld [vmem:[#allocation8 + $0x58] sm:$0xff] }
  0x53   :  { %1148 = vmatprep.subr.mxu1 %v231_v24  ;;  %1349 = vmatpush3.msra.mxu0 %v1802_v20  ;;  %v1820_v24 = vld [vmem:[#allocation8 + $0x50] sm:$0xff] }
  0x54   :  { %1149 = vmatpush3.msra.mxu1 %v215_v25  ;;  %1350 = vmatprep.subr.mxu0 %v1642_v19  ;;  %v1824_v25 = vld [vmem:[#allocation8 + $0x48] sm:$0xff] }
  0x55   :  { %1150 = vmatprep.subr.mxu1 %v230_v26  ;;  %1351 = vmatpush3.msra.mxu0 %v1808_v21  ;;  %v1828_v26 = vld [vmem:[#allocation8 + $0x40] sm:$0xff] }
  0x56   :  { %1151 = vmatpush3.msra.mxu1 %v214_v28  ;;  %1352 = vmatprep.subr.mxu0 %v1642_v19  ;;  %v1832_v28 = vld [vmem:[#allocation8 + $0x38] sm:$0xff] }
  0x57   :  { %1152 = vmatprep.subr.mxu1 %v229_v30  ;;  %1353 = vmatpush3.msra.mxu0 %v1812_v22  ;;  %v1836_v30 = vld [vmem:[#allocation8 + $0x30] sm:$0xff] }
  0x58   :  { %1153 = vmatpush3.msra.mxu1 %v213_v31  ;;  %1354 = vmatprep.subr.mxu0 %v1642_v19  ;;  %v1839_v31 = vld [vmem:[#allocation8 + $0x28] sm:$0xff] }
  0x59   :  { %1154 = vmatprep.subr.mxu1 %v228_v32  ;;  %1355 = vmatpush3.msra.mxu0 %v1816_v23  ;;  %v1842_v32 = vld [vmem:[#allocation8 + $0x20] sm:$0xff] }
  0x5a   :  { %1155 = vmatpush3.msra.mxu1 %v212_v36  ;;  %1356 = vmatprep.subr.mxu0 %v1642_v19  ;;  %v1860_v36 = vld [vmem:[#allocation8] sm:$0xff] }
  0x5b   :  { %1156 = vmatprep.subr.mxu1 %v227_v38  ;;  %1357 = vmatpush3.msra.mxu0 %v1820_v24 }
  0x5c   :  { %1157 = vmatpush3.msra.mxu1 %v211_v39  ;;  %1358 = vmatprep.subr.mxu0 %v1642_v19 }
  0x5d   :  { %1115 = vmatmul.mubr.msk.f32.vlgmr.msra.gmra.mxu1 %vm1746_vm1, %v134_v40  ;;  %1308 = vmatprep.subr.mxu1 %v258_v42 }
  0x5e   :  { %1309 = vmatpush3.msra.mxu1 %v258_v42  ;;  %328 = vmatprep.mubr.f32.mxu1 %v1742_v37 }
  0x5f   :  { %1310 = vmatprep.subr.mxu1 %v257_v46  ;;  %1359 = vmatpush3.msra.mxu0 %v1824_v25 }
  0x60   :  { %1311 = vmatpush3.msra.mxu1 %v257_v46  ;;  %1360 = vmatprep.subr.mxu0 %v1642_v19 }
  0x61   :  { %1312 = vmatprep.subr.mxu1 %v256_v47  ;;  %329 = vmatmul.mubr.f32.gmra.mxu1 %v133_v48 }
  0x62   :  { %1313 = vmatpush3.msra.mxu1 %v256_v47  ;;  %333 = vmatprep.mubr.f32.mxu1 %v1752_v45 }
  0x63   :  { %1314 = vmatprep.subr.mxu1 %v255_v51  ;;  %1361 = vmatpush3.msra.mxu0 %v1828_v26 }
  0x64   :  { %1315 = vmatpush3.msra.mxu1 %v255_v51  ;;  %1362 = vmatprep.subr.mxu0 %v1642_v19 }
  0x65   :  { %1316 = vmatprep.subr.mxu1 %v254_v52  ;;  %1116 = vmatmul.mubr.msk.f32.gmra.mxu1 %vm1763_vm2, %v132_v53 }
  0x66   :  { %1317 = vmatpush3.msra.mxu1 %v254_v52  ;;  %338 = vmatprep.mubr.f32.mxu1 %v1736_v29 }
  0x67   :  { %1318 = vmatprep.subr.mxu1 %v253_v57  ;;  %1363 = vmatpush3.msra.mxu0 %v1832_v28 }
  0x68   :  { %1319 = vmatpush3.msra.mxu1 %v253_v57  ;;  %1364 = vmatprep.subr.mxu0 %v1642_v19 }
  0x69   :  { %1320 = vmatprep.subr.mxu1 %v252_v58  ;;  %339 = vmatmul.mubr.f32.gmra.mxu1 %v131_v59 }
  0x6a   :  { %1321 = vmatpush3.msra.mxu1 %v252_v58  ;;  %1340 = vmatprep.mubr.f32.mxu1 %v201_v60 }
  0x6b   :  { %1322 = vmatprep.subr.mxu1 %v251_v61  ;;  %1365 = vmatpush3.msra.mxu0 %v1836_v30 }
  0x6c   :  { %1323 = vmatpush3.msra.mxu1 %v251_v61  ;;  %1366 = vmatprep.subr.mxu0 %v1642_v19 }
  0x6d   :  { %1324 = vmatprep.subr.mxu1 %v250_v62  ;;  %1378 = vmatprep.mubr.msk.f32.mxu0 %vm1643_vm6, %v1642_v19 }
  0x6e   :  { %1325 = vmatpush3.msra.mxu1 %v250_v62  ;;  %1367 = vmatpush3.msra.mxu0 %v1839_v31 }
  0x6f   :  { %1326 = vmatprep.subr.mxu1 %v249_v63  ;;  %1368 = vmatprep.subr.mxu0 %v1642_v19 }
  0x70   :  { %1327 = vmatpush3.msra.mxu1 %v249_v63  ;;  %1369 = vmatpush3.msra.mxu0 %v1842_v32 }
  0x71   :  { %1328 = vmatprep.subr.mxu1 %v248_v0  ;;  %1370 = vmatprep.subr.mxu0 %v1642_v19 }
  0x72   :  { %1329 = vmatpush3.msra.mxu1 %v248_v0  ;;  %1371 = vmatpush3.msra.mxu0 %v1848_v33 }
  0x73   :  { %1330 = vmatprep.subr.mxu1 %v247_v1  ;;  %1372 = vmatprep.subr.mxu0 %v1642_v19 }
  0x74   :  { %1331 = vmatpush3.msra.mxu1 %v247_v1  ;;  %1373 = vmatpush3.msra.mxu0 %v1852_v34 }
  0x75   :  { %1332 = vmatprep.subr.mxu1 %v246_v2  ;;  %1374 = vmatprep.subr.mxu0 %v1642_v19 }
  0x76   :  { %1333 = vmatpush3.msra.mxu1 %v246_v2  ;;  %1375 = vmatpush3.msra.mxu0 %v1856_v35 }
  0x77   :  { %1334 = vmatprep.subr.mxu1 %v245_v4  ;;  %1376 = vmatprep.subr.mxu0 %v1642_v19 }
  0x78   :  { %1335 = vmatpush3.msra.mxu1 %v245_v4  ;;  %1377 = vmatpush3.msra.mxu0 %v1860_v36 }
  0x79   :  { %1336 = vmatprep.subr.mxu1 %v244_v6 }
  0x7a   :  { %1337 = vmatpush3.msra.mxu1 %v244_v6 }
  0x7b   :  { %1338 = vmatprep.subr.mxu1 %v243_v10 }
  0x7c   :  { %1339 = vmatpush3.msra.mxu1 %v243_v10 }
  0x7d   :  { %1341 = vmatmul.mubr.msk.f32.vlgmr.msra.gmra.mxu1 %vm1783_vm4, %v200_v11 }
  0x7e   :  { %1343 = vmatprep.mubr.f32.mxu1 %v199_v15 }
  0x81   :  { %1344 = vmatmul.mubr.msk.f32.gmra.mxu1 %vm1793_vm5, %v202_v16 }
 0x11d   :  { %v1158_v38 = vpop.f32.mrf.mxu1 }
 0x11f   :  { %v1159_v39 = vpop.f32.mrf.mxu1 }
 0x120   :  { %v1160_v49 = vadd.f32 %v1159_v39, %v1158_v38 }
 0x121   :  { %v1161_v40 = vpop.f32.mrf.mxu1 }
 0x123   :  { %v1162_v42 = vpop.f32.mrf.mxu1 }
 0x124   :  { %v1163_v50 = vadd.f32 %v1162_v42, %v1161_v40 }
 0x125   :  { %v1164_v43 = vpop.f32.mrf.mxu1 }
 0x127   :  { %v1165_v44 = vpop.f32.mrf.mxu1 }
 0x128   :  { %v1166_v56 = vadd.f32 %v1165_v44, %v1164_v43  ;;  %v639_v44 = vld [vmem:[#allocation7 + $0xf8] sm:$0xff] }
 0x129   :  { %v1167_v46 = vpop.f32.mrf.mxu1  ;;  %1207 = vmatprep.subr.mxu1 %v639_v44  ;;  %v612_v44 = vld [vmem:[#allocation7 + $0x20] sm:$0xff] }
 0x12b   :  { %v1168_v47 = vpop.f32.mrf.mxu1 }
 0x12c   :  { %v1169_v57 = vadd.f32 %v1168_v47, %v1167_v46  ;;  %v623_v46 = vld [vmem:[#allocation7 + $0x78] sm:$0xff] }
 0x12d   :  { %v655_v47 = vld [vmem:[#allocation7 + $0x178] sm:$0xff]  ;;  %1208 = vmatpush3.msra.mxu1 %v623_v46  ;;  %v644_v46 = vld [vmem:[#allocation7 + $0x120] sm:$0xff] }
 0x12e   :  { %1381 = vmatprep.subr.mxu0 %v655_v47 }
 0x13d   :  { %v1342_v48 = vpop.f32.mrf.mxu1 }
 0x13e   :  { %v1865_v52 = vadd.f32 %v1342_v48, %v1163_v50  ;;  %v638_v48 = vld [vmem:[#allocation7 + $0xf0] sm:$0xff] }
 0x13f   :  { %v410_v51 = vpop.f32.mrf.mxu1  ;;  %1209 = vmatprep.subr.mxu1 %v638_v48  ;;  %v654_v50 = vld [vmem:[#allocation7 + $0x170] sm:$0xff]  ;;  %v611_v48 = vld [vmem:[#allocation7 + $0x18] sm:$0xff] }
 0x140   :  { %v1867_v53 = vadd.f32 %v1160_v49, %v410_v51  ;;  %v441_v60 = vmul.f32 %v1865_v52, %v1865_v52  ;;  %v622_v49 = vld [vmem:[#allocation7 + $0x70] sm:$0xff]  ;;  %v637_v51 = vld [vmem:[#allocation7 + $0xe8] sm:$0xff] }
 0x141   :  { %v1345_v55 = vpop.f32.mrf.mxu1  ;;  %1210 = vmatpush3.msra.mxu1 %v622_v49  ;;  %v643_v49 = vld [vmem:[#allocation7 + $0x118] sm:$0xff] }
 0x142   :  { %v440_v58 = vmul.f32 %v1867_v53, %v1867_v53  ;;  %v431_v61 = vadd.f32 %v1865_v52, %v1867_v53  ;;  %v1875_v62 = vadd.f32 %v1345_v55, %v1169_v57  ;;  %1211 = vmatprep.subr.mxu1 %v637_v51  ;;  %v621_v55 = vld [vmem:[#allocation7 + $0x68] sm:$0xff]  ;;  %v636_v57 = vld [vmem:[#allocation7 + $0xe0] sm:$0xff]  ;;  %v610_v51 = vld [vmem:[#allocation7 + $0x10] sm:$0xff] }
 0x143   :  { %v420_v59 = vpop.f32.mrf.mxu1  ;;  %1212 = vmatpush3.msra.mxu1 %v621_v55  ;;  %v642_v55 = vld [vmem:[#allocation7 + $0x110] sm:$0xff] }
 0x144   :  { %v1877_v63 = vadd.f32 %v1166_v56, %v420_v59  ;;  %v444_v0 = vadd.f32 %v441_v60, %v440_v58  ;;  %v443_v3 = vmul.f32 %v1875_v62, %v1875_v62  ;;  %v653_v56 = vld [vmem:[#allocation7 + $0x168] sm:$0xff]  ;;  %1213 = vmatprep.subr.mxu1 %v636_v57  ;;  %v620_v58 = vld [vmem:[#allocation7 + $0x60] sm:$0xff]  ;;  %v635_v60 = vld [vmem:[#allocation7 + $0xd8] sm:$0xff] }
 0x145   :  { %v652_v59 = vld [vmem:[#allocation7 + $0x160] sm:$0xff]  ;;  %1214 = vmatpush3.msra.mxu1 %v620_v58  ;;  %v609_v57 = vld [vmem:[#allocation7 + $0x8] sm:$0xff] }
 0x146   :  { %v432_v1 = vadd.f32 %v431_v61, %v1877_v63  ;;  %v442_v2 = vmul.f32 %v1877_v63, %v1877_v63  ;;  %1215 = vmatprep.subr.mxu1 %v635_v60  ;;  %v619_v61 = vld [vmem:[#allocation7 + $0x58] sm:$0xff]  ;;  %v641_v58 = vld [vmem:[#allocation7 + $0x108] sm:$0xff]  ;;  %v608_v60 = vld [vmem:[#allocation7] sm:$0xff] }
 0x147   :  { %1216 = vmatpush3.msra.mxu1 %v619_v61  ;;  %v640_v61 = vld [vmem:[#allocation7 + $0x100] sm:$0xff] }
 0x148   :  { %v433_v4 = vadd.f32 %v432_v1, %v1875_v62  ;;  %v445_v5 = vadd.f32 %v444_v0, %v442_v2  ;;  %v651_v0 = vld [vmem:[#allocation7 + $0x158] sm:$0xff]  ;;  %v634_v1 = vld [vmem:[#allocation7 + $0xd0] sm:$0xff] }
 0x149   :  { %1217 = vmatprep.subr.mxu1 %v634_v1  ;;  %v618_v2 = vld [vmem:[#allocation7 + $0x50] sm:$0xff] }
 0x14a   :  { %v434_v6 = vrot.slane %v433_v4, 4  ;;  %v446_v7 = vadd.f32 %v445_v5, %v443_v3  ;;  %v650_v3 = vld [vmem:[#allocation7 + $0x150] sm:$0xff]  ;;  %1218 = vmatpush3.msra.mxu1 %v618_v2  ;;  %v617_v5 = vld [vmem:[#allocation7 + $0x48] sm:$0xff] }
 0x14c   :  { %v435_v8 = vadd.f32 %v434_v6, %v433_v4  ;;  %v447_v9 = vrot.slane %v446_v7, 4  ;;  %v633_v4 = vld [vmem:[#allocation7 + $0xc8] sm:$0xff] }
 0x14d   :  { %1219 = vmatprep.subr.mxu1 %v633_v4  ;;  %v649_v6 = vld [vmem:[#allocation7 + $0x148] sm:$0xff] }
 0x14e   :  { %v436_v10 = vrot.slane %v435_v8, 2  ;;  %v448_v11 = vadd.f32 %v447_v9, %v446_v7  ;;  %1220 = vmatpush3.msra.mxu1 %v617_v5  ;;  %v632_v7 = vld [vmem:[#allocation7 + $0xc0] sm:$0xff] }
 0x14f   :  { %v648_v9 = vld [vmem:[#allocation7 + $0x140] sm:$0xff]  ;;  %1221 = vmatprep.subr.mxu1 %v632_v7 }
 0x150   :  { %v437_v14 = vadd.f32 %v436_v10, %v435_v8  ;;  %v449_v15 = vrot.slane %v448_v11, 2  ;;  %v616_v8 = vld [vmem:[#allocation7 + $0x40] sm:$0xff]  ;;  %v631_v10 = vld [vmem:[#allocation7 + $0xb8] sm:$0xff] }
 0x151   :  { %1222 = vmatpush3.msra.mxu1 %v616_v8  ;;  %v1644_v8 = vmov 1966171168  }
 0x152   :  { %v438_v16 = vrot.slane %v437_v14, 1  ;;  %v450_v38 = vadd.f32 %v449_v15, %v448_v11  ;;  %v615_v11 = vld [vmem:[#allocation7 + $0x38] sm:$0xff]  ;;  %v630_v15 = vld [vmem:[#allocation7 + $0xb0] sm:$0xff]  ;;  %1223 = vmatprep.subr.mxu1 %v631_v10 }
 0x153   :  { %1224 = vmatpush3.msra.mxu1 %v615_v11 }
 0x154   :  { %v451_v39 = vrot.slane %v450_v38, 1  ;;  %v439_v40 = vadd.f32 %v438_v16, %v437_v14  ;;  %v647_v14 = vld [vmem:[#allocation7 + $0x138] sm:$0xff]  ;;  %v614_v16 = vld [vmem:[#allocation7 + $0x30] sm:$0xff]  ;;  %1225 = vmatprep.subr.mxu1 %v630_v15  ;;  %v1891_v15 = vsub.s32 0, %v1734_v27 }
 0x155   :  { %1226 = vmatpush3.msra.mxu1 %v614_v16 }
 0x156   :  { %v452_v42 = vadd.f32 %v451_v39, %v450_v38  ;;  %v646_v38 = vld [vmem:[#allocation7 + $0x130] sm:$0xff]  ;;  %v629_v39 = vld [vmem:[#allocation7 + $0xa8] sm:$0xff] }
 0x157   :  { %1227 = vmatprep.subr.mxu1 %v629_v39 }
 0x158   :  { %v454_v43 = vsel %vm453_vm7, %v439_v40, %v452_v42  ;;  %v613_v40 = vld [vmem:[#allocation7 + $0x28] sm:$0xff] }
 0x159   :  { %1379 = vmatmul.mubr.f32.vlgmr.msra.gmra.mxu0 %v454_v43  ;;  %v645_v42 = vld [vmem:[#allocation7 + $0x128] sm:$0xff]  ;;  %v628_v43 = vld [vmem:[#allocation7 + $0xa0] sm:$0xff]  ;;  %1228 = vmatpush3.msra.mxu1 %v613_v40 }
 0x15a   :  { %1382 = vmatpush3.msra.mxu0 %v655_v47  ;;  %v627_v47 = vld [vmem:[#allocation7 + $0x98] sm:$0xff]  ;;  %1229 = vmatprep.subr.mxu1 %v628_v43  ;;  %v429_v40 = vld [vmem:[%s1990_s2] sm:$0x1] }
 0x15b   :  { %1383 = vmatprep.subr.mxu0 %v654_v50  ;;  %1230 = vmatpush3.msra.mxu1 %v612_v44 }
 0x15c   :  { %1384 = vmatpush3.msra.mxu0 %v654_v50  ;;  %v626_v50 = vld [vmem:[#allocation7 + $0x90] sm:$0xff]  ;;  %1231 = vmatprep.subr.mxu1 %v627_v47 }
 0x15d   :  { %1385 = vmatprep.subr.mxu0 %v653_v56  ;;  %1232 = vmatpush3.msra.mxu1 %v611_v48 }
 0x15e   :  { %1386 = vmatpush3.msra.mxu0 %v653_v56  ;;  %v625_v56 = vld [vmem:[#allocation7 + $0x88] sm:$0xff]  ;;  %1233 = vmatprep.subr.mxu1 %v626_v50  ;;  %v1119_v50 = vld [vmem:[%s1991_s3] ss:$0 sm:$0xff] }
 0x15f   :  { %1387 = vmatprep.subr.mxu0 %v652_v59  ;;  %1234 = vmatpush3.msra.mxu1 %v610_v51 }
 0x160   :  { %1388 = vmatpush3.msra.mxu0 %v652_v59  ;;  %1235 = vmatprep.subr.mxu1 %v625_v56  ;;  %v624_v59 = vld [vmem:[#allocation7 + $0x80] sm:$0xff] }
 0x161   :  { %1389 = vmatprep.subr.mxu0 %v651_v0  ;;  %1236 = vmatpush3.msra.mxu1 %v609_v57 }
 0x162   :  { %1390 = vmatpush3.msra.mxu0 %v651_v0  ;;  %1237 = vmatprep.subr.mxu1 %v624_v59 }
 0x163   :  { %1391 = vmatprep.subr.mxu0 %v650_v3  ;;  %1238 = vmatpush3.msra.mxu1 %v608_v60 }
 0x164   :  { %1392 = vmatpush3.msra.mxu0 %v650_v3  ;;  %1419 = vmatprep.subr.mxu1 %v1642_v19 }
 0x165   :  { %1393 = vmatprep.subr.mxu0 %v649_v6 }
 0x166   :  { %1394 = vmatpush3.msra.mxu0 %v649_v6 }
 0x167   :  { %1395 = vmatprep.subr.mxu0 %v648_v9 }
 0x168   :  { %1396 = vmatpush3.msra.mxu0 %v648_v9  ;;  %v536_v9 = vunpack.c.l.s4 %v1644_v8 }
 0x169   :  { %1397 = vmatprep.subr.mxu0 %v647_v14 }
 0x16a   :  { %1398 = vmatpush3.msra.mxu0 %v647_v14  ;;  %v537_v10 = vunpack.c.0.s8 %v536_v9 }
 0x16b   :  { %1399 = vmatprep.subr.mxu0 %v646_v38 }
 0x16c   :  { %1400 = vmatpush3.msra.mxu0 %v646_v38  ;;  %v1888_v11 = vsub.s32 %v537_v10, %v1734_v27  ;;  %v990_v27 = vld [vmem:[#allocation10 + $0x70] sm:$0xff] }
 0x16d   :  { %1401 = vmatprep.subr.mxu0 %v645_v42 }
 0x16e   :  { %1402 = vmatpush3.msra.mxu0 %v645_v42 }
 0x16f   :  { %1403 = vmatprep.subr.mxu0 %v644_v46 }
 0x170   :  { %1404 = vmatpush3.msra.mxu0 %v644_v46 }
 0x171   :  { %1405 = vmatprep.subr.mxu0 %v643_v49 }
 0x172   :  { %1406 = vmatpush3.msra.mxu0 %v643_v49 }
 0x173   :  { %1407 = vmatprep.subr.mxu0 %v642_v55 }
 0x174   :  { %1408 = vmatpush3.msra.mxu0 %v642_v55 }
 0x175   :  { %1409 = vmatprep.subr.mxu0 %v641_v58 }
 0x176   :  { %1410 = vmatpush3.msra.mxu0 %v641_v58 }
 0x177   :  { %1411 = vmatprep.subr.mxu0 %v640_v61 }
 0x178   :  { %1412 = vmatpush3.msra.mxu0 %v640_v61 }
 0x219   :  { %v521_v0 = vpop.f32.mrf.mxu0 }
 0x21a   :  { %v525_v1 = vmul.f32 0.001953125, %v521_v0 }
 0x21b   :  { %v1380_v2 = vpop.f32.mrf.mxu0 }
 0x21c   :  { %v526_v3 = vmul.f32 %v525_v1, %v525_v1  ;;  %v555_v39 = vrot.slane %v525_v1, %v1891_v15 }
 0x21e   :  { %v528_v4 = vrot.slane %v526_v3, 7  ;;  %v557_v44 = vsub.f32 %v1865_v52, %v555_v39  ;;  %v558_v46 = vsub.f32 %v1877_v63, %v555_v39  ;;  %v559_v47 = vsub.f32 %v1875_v62, %v555_v39 }
 0x21f   :  { %v556_v48 = vsub.f32 %v1867_v53, %v555_v39 }
 0x220   :  { %v530_v5 = vsub.f32 %v525_v1, %v528_v4 }
 0x222   :  { %v531_v6 = vmax.f32 %v530_v5, 0.0 }
 0x224   :  { %v532_v7 = vadd.f32 1e-05, %v531_v6 }
 0x226   :  { %1503 = vrsqrt.f32 %v532_v7 }
 0x233   :  { %v1504_v14 = vpop.eup %1503 }
 0x234   :  { %v541_v16 = vrot.slane %v1504_v14, %v1888_v11 }
 0x236   :  { %v542_v38 = vcombine.high %v541_v16, %v541_v16 }
 0x238   :  { %v549_v42 = vrot.slane %v542_v38, %v1888_v11 }
 0x23a   :  { %v551_v43 = vmul.f32 %v549_v42, %v429_v40 }
 0x23c   :  { %v564_v49 = vrot.slane %v551_v43, %v1891_v15 }
 0x23e   :  { %v566_v51 = vmul.f32 %v564_v49, %v556_v48  ;;  %v568_v55 = vmul.f32 %v564_v49, %v558_v46  ;;  %v569_v56 = vmul.f32 %v564_v49, %v559_v47  ;;  %v567_v57 = vmul.f32 %v564_v49, %v557_v44 }
 0x240   :  { %v576_v58 = vadd.f32 %v1119_v50, %v566_v51  ;;  %v578_v59 = vadd.f32 %v1119_v50, %v568_v55  ;;  %v579_v60 = vadd.f32 %v1119_v50, %v569_v56  ;;  %v577_v52 = vadd.f32 %v1119_v50, %v567_v57 }
 0x242   :  { %v580_v61 = vmax.f32 %v576_v58, 0.0  ;;  %v582_v63 = vmax.f32 %v578_v59, 0.0  ;;  %v583_v0 = vmax.f32 %v579_v60, 0.0  ;;  %v581_v62 = vmax.f32 %v577_v52, 0.0 }
 0x244   :  { %v584_v1 = vrot.slane %v580_v61, 7  ;;  %720 = vmatprep.mubr.f32.mxu1 %v580_v61  ;;  %v587_v53 = vrot.slane %v583_v0, 7  ;;  %v596_v2 = vrot.slane %v580_v61, 1  ;;  %v597_v3 = vrot.slane %v581_v62, 1 }
 0x245   :  { %v598_v4 = vrot.slane %v582_v63, 1  ;;  %v599_v5 = vrot.slane %v583_v0, 1  ;;  %v585_v8 = vrot.slane %v581_v62, 7  ;;  %v586_v16 = vrot.slane %v582_v63, 7 }
 0x246   :  { %v591_v6 = vsel %vm130_vm0, %v587_v53, %v584_v1  ;;  %v602_v7 = vsel %vm198_vm3, %v596_v2, %v597_v3 }
 0x247   :  { %1120 = vmatmul.mubr.msk.f32.vlgmr.msra.gmra.mxu1 %vm1746_vm1, %v591_v6  ;;  %1413 = vmatprep.mubr.f32.mxu0 %v602_v7  ;;  %v601_v9 = vsel %vm198_vm3, %v597_v3, %v598_v4  ;;  %v600_v10 = vsel %vm198_vm3, %v598_v4, %v599_v5  ;;  %v590_v14 = vsel %vm130_vm0, %v584_v1, %v585_v8 }
 0x248   :  { %725 = vmatprep.mubr.f32.mxu1 %v581_v62  ;;  %1414 = vmatmul.mubr.msk.f32.vlgmr.msra.gmra.mxu0 %vm1783_vm4, %v601_v9  ;;  %v603_v41 = vsel %vm198_vm3, %v599_v5, %v596_v2  ;;  %v589_v12 = vsel %vm130_vm0, %v585_v8, %v586_v16  ;;  %v588_v17 = vsel %vm130_vm0, %v586_v16, %v587_v53 }
 0x249   :  { %1416 = vmatprep.mubr.f32.mxu0 %v600_v10  ;;  %1420 = vmatpush3.msra.mxu1 %v1799_v18  ;;  %v988_v18 = vld [vmem:[#allocation10 + $0x60] sm:$0xff] }
 0x24a   :  { %1421 = vmatprep.subr.mxu1 %v1642_v19 }
 0x24b   :  { %726 = vmatmul.mubr.f32.gmra.mxu1 %v590_v14 }
 0x24c   :  { %730 = vmatprep.mubr.f32.mxu1 %v582_v63  ;;  %1417 = vmatmul.mubr.msk.f32.gmra.mxu0 %vm1793_vm5, %v603_v41 }
 0x24d   :  { %1422 = vmatpush3.msra.mxu1 %v1802_v20  ;;  %1486 = vmatprep.mubr.f32.mxu0 %v1731_v13  ;;  %v991_v13 = vld [vmem:[#allocation10 + $0x78] sm:$0xff] }
 0x24e   :  { %1423 = vmatprep.subr.mxu1 %v1642_v19  ;;  %1454 = vmatprep.subr.mxu0 %v991_v13  ;;  %v987_v20 = vld [vmem:[#allocation10 + $0x58] sm:$0xff] }
 0x24f   :  { %1121 = vmatmul.mubr.msk.f32.gmra.mxu1 %vm1763_vm2, %v589_v12  ;;  %1455 = vmatpush3.msra.mxu0 %v991_v13 }
 0x250   :  { %735 = vmatprep.mubr.f32.mxu1 %v583_v0  ;;  %1424 = vmatpush3.msra.mxu1 %v1808_v21  ;;  %v986_v21 = vld [vmem:[#allocation10 + $0x50] sm:$0xff] }
 0x251   :  { %1425 = vmatprep.subr.mxu1 %v1642_v19  ;;  %1456 = vmatprep.subr.mxu0 %v990_v27 }
 0x252   :  { %1426 = vmatpush3.msra.mxu1 %v1812_v22  ;;  %1457 = vmatpush3.msra.mxu0 %v990_v27  ;;  %v985_v22 = vld [vmem:[#allocation10 + $0x48] sm:$0xff] }
 0x253   :  { %736 = vmatmul.mubr.f32.gmra.mxu1 %v588_v17  ;;  %1427 = vmatprep.subr.mxu1 %v1642_v19 }
 0x254   :  { %1428 = vmatpush3.msra.mxu1 %v1816_v23  ;;  %1451 = vmatprep.mubr.msk.f32.mxu1 %vm1643_vm6, %v1642_v19  ;;  %v983_v23 = vld [vmem:[#allocation10 + $0x38] sm:$0xff] }
 0x255   :  { %1429 = vmatprep.subr.mxu1 %v1642_v19  ;;  %1458 = vmatprep.subr.mxu0 %v989_v54 }
 0x256   :  { %1430 = vmatpush3.msra.mxu1 %v1820_v24  ;;  %1459 = vmatpush3.msra.mxu0 %v989_v54  ;;  %v982_v24 = vld [vmem:[#allocation10 + $0x30] sm:$0xff] }
 0x257   :  { %1431 = vmatprep.subr.mxu1 %v1642_v19  ;;  %1460 = vmatprep.subr.mxu0 %v988_v18 }
 0x258   :  { %1432 = vmatpush3.msra.mxu1 %v1824_v25  ;;  %1461 = vmatpush3.msra.mxu0 %v988_v18  ;;  %v981_v25 = vld [vmem:[#allocation10 + $0x28] sm:$0xff] }
 0x259   :  { %1433 = vmatprep.subr.mxu1 %v1642_v19  ;;  %1462 = vmatprep.subr.mxu0 %v987_v20 }
 0x25a   :  { %1434 = vmatpush3.msra.mxu1 %v1828_v26  ;;  %1463 = vmatpush3.msra.mxu0 %v987_v20  ;;  %v980_v26 = vld [vmem:[#allocation10 + $0x20] sm:$0xff] }
 0x25b   :  { %1435 = vmatprep.subr.mxu1 %v1642_v19  ;;  %1464 = vmatprep.subr.mxu0 %v986_v21 }
 0x25c   :  { %1436 = vmatpush3.msra.mxu1 %v1832_v28  ;;  %1465 = vmatpush3.msra.mxu0 %v986_v21  ;;  %v979_v28 = vld [vmem:[#allocation10 + $0x18] sm:$0xff] }
 0x25d   :  { %1437 = vmatprep.subr.mxu1 %v1642_v19  ;;  %1466 = vmatprep.subr.mxu0 %v985_v22 }
 0x25e   :  { %1438 = vmatpush3.msra.mxu1 %v1836_v30  ;;  %1467 = vmatpush3.msra.mxu0 %v985_v22  ;;  %v978_v30 = vld [vmem:[#allocation10 + $0x10] sm:$0xff] }
 0x25f   :  { %1439 = vmatprep.subr.mxu1 %v1642_v19 }
 0x260   :  { %1440 = vmatpush3.msra.mxu1 %v1839_v31  ;;  %v977_v31 = vld [vmem:[#allocation10 + $0x8] sm:$0xff] }
 0x261   :  { %1441 = vmatprep.subr.mxu1 %v1642_v19 }
 0x262   :  { %1442 = vmatpush3.msra.mxu1 %v1842_v32  ;;  %v976_v32 = vld [vmem:[#allocation10] sm:$0xff] }
 0x263   :  { %1443 = vmatprep.subr.mxu1 %v1642_v19 }
 0x264   :  { %1444 = vmatpush3.msra.mxu1 %v1848_v33 }
 0x265   :  { %1445 = vmatprep.subr.mxu1 %v1642_v19 }
 0x266   :  { %1446 = vmatpush3.msra.mxu1 %v1852_v34 }
 0x267   :  { %1447 = vmatprep.subr.mxu1 %v1642_v19 }
 0x268   :  { %1448 = vmatpush3.msra.mxu1 %v1856_v35 }
 0x269   :  { %1449 = vmatprep.subr.mxu1 %v1642_v19  ;;  %v984_v19 = vld [vmem:[#allocation10 + $0x40] sm:$0xff] }
 0x26a   :  { %1450 = vmatpush3.msra.mxu1 %v1860_v36  ;;  %1468 = vmatprep.subr.mxu0 %v984_v19 }
 0x26b   :  { %1469 = vmatpush3.msra.mxu0 %v984_v19 }
 0x26c   :  { %1470 = vmatprep.subr.mxu0 %v983_v23 }
 0x26d   :  { %1471 = vmatpush3.msra.mxu0 %v983_v23 }
 0x26e   :  { %1472 = vmatprep.subr.mxu0 %v982_v24 }
 0x26f   :  { %1473 = vmatpush3.msra.mxu0 %v982_v24 }
 0x270   :  { %1474 = vmatprep.subr.mxu0 %v981_v25 }
 0x271   :  { %1475 = vmatpush3.msra.mxu0 %v981_v25 }
 0x272   :  { %1476 = vmatprep.subr.mxu0 %v980_v26 }
 0x273   :  { %1477 = vmatpush3.msra.mxu0 %v980_v26  ;;  %v826_v26 = vld [vmem:[%s1993_s5] sm:$0x1]  ;;  %s1645_s5 = smov [#allocation11]  }
 0x274   :  { %1478 = vmatprep.subr.mxu0 %v979_v28 }
 0x275   :  { %1479 = vmatpush3.msra.mxu0 %v979_v28 }
 0x276   :  { %1480 = vmatprep.subr.mxu0 %v978_v30 }
 0x277   :  { %1481 = vmatpush3.msra.mxu0 %v978_v30 }
 0x278   :  { %1482 = vmatprep.subr.mxu0 %v977_v31 }
 0x279   :  { %1483 = vmatpush3.msra.mxu0 %v977_v31 }
 0x27a   :  { %1484 = vmatprep.subr.mxu0 %v976_v32 }
 0x27b   :  { %1485 = vmatpush3.msra.mxu0 %v976_v32 }
 0x27c   :  { %1487 = vmatmul.mubr.f32.vlgmr.msra.gmra.mxu0 %v1742_v37 }
 0x27d   :  { %1489 = vmatprep.mubr.f32.mxu0 %v1752_v45 }
 0x280   :  { %1490 = vmatmul.mubr.f32.gmra.mxu0 %v1736_v29 }
 0x307   :  { %v1239_v33 = vpop.f32.mrf.mxu1 }
 0x308   :  { %v1415_v34 = vpop.f32.mrf.mxu0 }
 0x309   :  { %v1240_v35 = vpop.f32.mrf.mxu1 }
 0x30a   :  { %v807_v36 = vpop.f32.mrf.mxu0  ;;  %v1241_v40 = vadd.f32 %v1240_v35, %v1239_v33 }
 0x30b   :  { %v1242_v38 = vpop.f32.mrf.mxu1 }
 0x30c   :  { %v1418_v43 = vpop.f32.mrf.mxu0  ;;  %v808_v48 = vadd.f32 %v1241_v40, %v807_v36  ;;  %v1124_v40 = vld [vmem:[%s1994_s6] ss:$0 sm:$0xff] }
 0x30d   :  { %v1243_v39 = vpop.f32.mrf.mxu1 }
 0x30e   :  { %v1244_v42 = vadd.f32 %v1243_v39, %v1242_v38  ;;  %v817_v50 = vpop.f32.mrf.mxu0  ;;  %v837_v29 = vmul.f32 %v808_v48, %v808_v48 }
 0x30f   :  { %v1245_v44 = vpop.f32.mrf.mxu1 }
 0x310   :  { %v813_v46 = vadd.f32 %v1415_v34, %v1244_v42  ;;  %v1125_v34 = vld [vmem:[%s1997_s9] ss:$0 sm:$0xff]  ;;  %s1101_s9 = sshll.u32 %s1645_s5, 4  ;;  %s1102_s9 = int_to_ptr.vmem [resolvable:$true] %s1101_s9 }
 0x311   :  { %v1246_v47 = vpop.f32.mrf.mxu1  ;;  %s1607_s6 = scalar_lea.vmem %s1102_s9, 512  ;;  %p1612_p12 = scmp.lt.s32.totalorder %s1102_s9, %s1102_s9 }
 0x312   :  { %v1247_v49 = vadd.f32 %v1246_v47, %v1245_v44  ;;  %v838_v51 = vmul.f32 %v813_v46, %v813_v46  ;;  %v828_v56 = vadd.f32 %v813_v46, %v808_v48  ;;  %p1608_p11 = scmp.ne.s32.totalorder %s1102_s9, %s1607_s6  ;;  %p1613_p13 = scmp.lt.s32.totalorder %s1607_s6, %s1607_s6 }
 0x313   :  { %v1248_v37 = vpop.f32.mrf.mxu1 }
 0x314   :  { %v818_v45 = vadd.f32 %v1247_v49, %v817_v50  ;;  %v841_v59 = vadd.f32 %v838_v51, %v837_v29  ;;  %p1614_p0 = por %p1613_p13, %p1612_p12 }
 0x315   :  { %v1249_v55 = vpop.f32.mrf.mxu1 }
 0x316   :  { %v839_v57 = vmul.f32 %v818_v45, %v818_v45  ;;  %v1250_v58 = vadd.f32 %v1249_v55, %v1248_v37  ;;  %v829_v60 = vadd.f32 %v828_v56, %v818_v45  ;;  %p1615_p1 = pnand %p1614_p0, %p1608_p11 }
 0x318   :  { %v823_v52 = vadd.f32 %v1418_v43, %v1250_v58  ;;  %v842_v61 = vadd.f32 %v841_v59, %v839_v57 }
 0x31a   :  { %v830_v63 = vadd.f32 %v829_v60, %v823_v52  ;;  %v840_v0 = vmul.f32 %v823_v52, %v823_v52 }
 0x31c   :  { %v831_v62 = vrot.slane %v830_v63, 4  ;;  %v843_v1 = vadd.f32 %v842_v61, %v840_v0 }
 0x31e   :  { %v832_v53 = vadd.f32 %v831_v62, %v830_v63  ;;  %v844_v2 = vrot.slane %v843_v1, 4 }
 0x320   :  { %v833_v3 = vrot.slane %v832_v53, 2  ;;  %v845_v4 = vadd.f32 %v844_v2, %v843_v1 }
 0x322   :  { %v834_v5 = vadd.f32 %v833_v3, %v832_v53  ;;  %v846_v6 = vrot.slane %v845_v4, 2 }
 0x324   :  { %v835_v7 = vrot.slane %v834_v5, 1  ;;  %v847_v8 = vadd.f32 %v846_v6, %v845_v4 }
 0x326   :  { %v848_v9 = vrot.slane %v847_v8, 1  ;;  %v836_v10 = vadd.f32 %v835_v7, %v834_v5 }
 0x328   :  { %v849_v14 = vadd.f32 %v848_v9, %v847_v8 }
 0x32a   :  { %v850_v16 = vsel %vm453_vm7, %v836_v10, %v849_v14 }
 0x32b   :  { %1452 = vmatmul.mubr.f32.vlgmr.msra.gmra.mxu1 %v850_v16 }
 0x33c   :  { %v1488_v21 = vpop.f32.mrf.mxu0 }
 0x33d   :  { %v1071_v47 = vadd.f32 %v1488_v21, %v1125_v34 }
 0x33e   :  { %v1065_v23 = vpop.f32.mrf.mxu0 }
 0x340   :  { %v1491_v30 = vpop.f32.mrf.mxu0 }
 0x341   :  { %v1081_v49 = vadd.f32 %v1491_v30, %v1125_v34 }
 0x342   :  { %v1075_v39 = vpop.f32.mrf.mxu0 }
 0x3eb   :  { %v917_v41 = vpop.f32.mrf.mxu1 }
 0x3ec   :  { %v921_v12 = vmul.f32 0.001953125, %v917_v41 }
 0x3ed   :  { %v1453_v17 = vpop.f32.mrf.mxu1 }
 0x3ee   :  { %v922_v13 = vmul.f32 %v921_v12, %v921_v12  ;;  %v951_v25 = vrot.slane %v921_v12, %v1891_v15 }
 0x3f0   :  { %v924_v27 = vrot.slane %v922_v13, 7  ;;  %v953_v32 = vsub.f32 %v813_v46, %v951_v25  ;;  %v952_v35 = vsub.f32 %v808_v48, %v951_v25  ;;  %v955_v36 = vsub.f32 %v823_v52, %v951_v25 }
 0x3f1   :  { %v954_v38 = vsub.f32 %v818_v45, %v951_v25  ;;  %v1066_v46 = vadd.f32 %v1125_v34, %v1065_v23 }
 0x3f2   :  { %v926_v54 = vsub.f32 %v921_v12, %v924_v27 }
 0x3f4   :  { %v927_v18 = vmax.f32 %v926_v54, 0.0 }
 0x3f6   :  { %v928_v20 = vadd.f32 1e-05, %v927_v18 }
 0x3f8   :  { %1505 = vrsqrt.f32 %v928_v20 }
 0x405   :  { %v1506_v22 = vpop.eup %1505 }
 0x406   :  { %v937_v19 = vrot.slane %v1506_v22, %v1888_v11 }
 0x408   :  { %v938_v24 = vcombine.high %v937_v19, %v937_v19 }
 0x40a   :  { %v945_v28 = vrot.slane %v938_v24, %v1888_v11 }
 0x40c   :  { %v947_v31 = vmul.f32 %v945_v28, %v826_v26 }
 0x40e   :  { %v960_v33 = vrot.slane %v947_v31, %v1891_v15  ;;  %v1076_v15 = vadd.f32 %v1125_v34, %v1075_v39 }
 0x410   :  { %v963_v42 = vmul.f32 %v960_v33, %v953_v32  ;;  %v962_v43 = vmul.f32 %v960_v33, %v952_v35  ;;  %v965_v11 = vmul.f32 %v960_v33, %v955_v36  ;;  %v964_v44 = vmul.f32 %v960_v33, %v954_v38 }
 0x412   :  { %v973_v50 = vadd.f32 %v1124_v40, %v963_v42  ;;  %v972_v37 = vadd.f32 %v1124_v40, %v962_v43  ;;  %v975_v51 = vadd.f32 %v1124_v40, %v965_v11  ;;  %v974_v55 = vadd.f32 %v1124_v40, %v964_v44 }
 0x414   :  { %v1085_v48 = vadd.f32 %v1071_v47, %v973_v50  ;;  %v1084_v45 = vadd.f32 %v1066_v46, %v972_v37  ;;  %v1087_v29 = vadd.f32 %v1081_v49, %v975_v51  ;;  %v1086_v56 = vadd.f32 %v1076_v15, %v974_v55 }
 0x416   :  { %v1089_v57 = vmax.f32 %v1085_v48, 0.0  ;;  %v1088_v58 = vmax.f32 %v1084_v45, 0.0  ;;  %v1091_v59 = vmax.f32 %v1087_v29, 0.0  ;;  %v1090_v60 = vmax.f32 %v1086_v56, 0.0 }
 0x418   :  { %1093 = vst [vmem:[#allocation11 + $0x8] sm:$0xff] %v1089_v57  ;;  %1092 = vst [vmem:[#allocation11] sm:$0xff] %v1088_v58 }
 0x419   :  { %1095 = vst [vmem:[#allocation11 + $0x18] sm:$0xff] %v1091_v59  ;;  %1094 = vst [vmem:[#allocation11 + $0x10] sm:$0xff] %v1090_v60 }
 0x41a   :  { %1618 = shalt.err (!%p1615_p1)
}
 0x41b   :  { %1107 = dma.vmem_to_hbm [thread:$0]  %s1102_s9, 512, %s1998_s10, [#allocation4], %s1637_s18, %s1637_s18, %s1638_s19  }
 0x41c   :  { %1633 = dma.done.wait [#allocation4], 512  }
 0x41d   :  { %1634 = vsyncadd [#allocation4], 4294966784 }
 0x41e   :  { %1111 = vsyncpa [#allocation3], 1 }
 0x41f   :  { %1112 = vsyncpa [#allocation6], 1 }
 0x420   :  { %1113 = vsyncpa [#allocation9], 1 }
 0x421   :  { %1114 = vsyncpa [#allocation4], 1 }

</bundles_post_ra>
